<compile_context>
chip_gen: v6e
topology: v6e:2x2x1
jax: 0.10.0
libtpu: 0.0.40
codegen_flags: <defaults>
</compile_context>

<pallas_src>
import jax
import jax.numpy as jnp
from jax.experimental import pallas as pl
from jax.experimental.pallas import tpu as pltpu

# ---- model hyper-parameters (small, deterministic) -------------------------
B = 2             # batch
CIN = 3           # input channels (image-like)
H = W = 16        # spatial
HID = 32          # backbone feature dim == last_linear.in_features
EMB = 64          # opt.embed_dim
BN_EPS = 1e-5
NORM_EPS = 1e-12  # torch.nn.functional.normalize default eps

KCOL = 9 * CIN    # im2col contraction size (3*3*CIN = 27)
KB = KCOL + 1     # +1 all-ones column carrying the folded BN shift
ROWS = B * H * W  # im2col rows (whole batch)


def _embed_kernel(patches_ref, wconv_ref, wemb_ref, bemb_ref, out_ref):
    """Whole forward pass, single invocation, everything resident in VMEM."""
    # 3x3 conv (im2col) + frozen BN: scale folded into the weights, shift
    # carried by the all-ones bias column -> one bf16 MXU matmul, f32 accum.
    h = jnp.dot(patches_ref[...], wconv_ref[...],
                preferred_element_type=jnp.float32)            # (ROWS, HID)
    h = jnp.maximum(h, 0.0)                                    # ReLU
    # Global average pool as a sublane (XLU) reduce; 1/(H*W) folded into w_emb.
    feat = jnp.sum(jnp.reshape(h, (B, H * W, HID)), axis=1)    # (B, HID)
    # Embedding linear (last_linear replacement), f32 (tiny, keep full precision).
    emb = jnp.dot(feat, wemb_ref[...],
                  preferred_element_type=jnp.float32) + bemb_ref[...]  # (B, EMB)
    # L2 normalize along dim=-1: x / max(||x||, eps)  (torch F.normalize).
    sq = jnp.sum(emb * emb, axis=-1, keepdims=True)
    out_ref[...] = emb * jax.lax.rsqrt(jnp.maximum(sq, NORM_EPS * NORM_EPS))


@jax.jit
def network_forward(x_nchw, w_conv, bn_gamma, bn_beta, bn_mean, bn_var,
                    w_emb, b_emb):
    """x_nchw: (B, CIN, H, W) float32 -> (B, EMB) L2-normalized embeddings."""
    # --- im2col in ONE op (bf16: MXU-native, halves the patches DMA) --------
    x_bf = x_nchw.astype(jnp.bfloat16)
    patches = jax.lax.conv_general_dilated_patches(
        x_bf, filter_shape=(3, 3), window_strides=(1, 1), padding="SAME",
        dimension_numbers=("NCHW", "HWIO", "NHWC"))            # (B, H, W, 27)
    patches = patches.reshape(ROWS, KCOL)
    # extra all-ones column #27 carries the folded BN shift (see w_conv_aug)
    patches = jnp.pad(patches, ((0, 0), (0, 1)),
                      constant_values=1.0)                     # (ROWS, KB) bf16

    # --- fold frozen-BN scale into conv weights, shift into the bias row ----
    bn_scale = bn_gamma / jnp.sqrt(bn_var + BN_EPS)            # (HID,)
    bn_shift = bn_beta - bn_mean * bn_scale                    # (HID,)
    # conv_general_dilated_patches orders the patch axis as (cin, kh, kw):
    w_flat = jnp.transpose(w_conv, (2, 0, 1, 3)).reshape(KCOL, HID)
    w_conv_aug = jnp.concatenate(
        [w_flat * bn_scale[None, :], bn_shift[None, :]], axis=0)  # (KB, HID)
    w_conv_aug = w_conv_aug.astype(jnp.bfloat16)

    # --- fold 1/(H*W) of the GAP into the embedding weights -----------------
    w_emb_eff = w_emb * (1.0 / (H * W))                        # (HID, EMB)
    b_emb2 = b_emb.reshape(1, EMB)

    # --- single no-grid pallas_call: full arrays resident in VMEM -----------
    vmem = pl.BlockSpec(memory_space=pltpu.MemorySpace.VMEM)
    return pl.pallas_call(
        _embed_kernel,
        out_shape=jax.ShapeDtypeStruct((B, EMB), jnp.float32),
        in_specs=[vmem, vmem, vmem, vmem],
        out_specs=vmem,
    )(patches, w_conv_aug, w_emb_eff, b_emb2)


def _reference_forward(x_nchw, w_conv, bn_gamma, bn_beta, bn_mean, bn_var,
                       w_emb, b_emb):
    """Pure-JAX reference with PyTorch semantics (frozen BN, SAME 3x3 conv)."""
    y = jax.lax.conv_general_dilated(
        x_nchw.astype(jnp.float32), w_conv,
        window_strides=(1, 1), padding="SAME",
        dimension_numbers=("NCHW", "HWIO", "NCHW"),
        precision=jax.lax.Precision.HIGHEST)                   # (B, HID, H, W)
    scale = bn_gamma / jnp.sqrt(bn_var + BN_EPS)
    shift = bn_beta - bn_mean * scale
    y = y * scale[None, :, None, None] + shift[None, :, None, None]
    y = jnp.maximum(y, 0.0)
    feat = jnp.mean(y, axis=(2, 3))                            # (B, HID)
    emb = jnp.dot(feat, w_emb, precision=jax.lax.Precision.HIGHEST) + b_emb
    norm = jnp.sqrt(jnp.sum(emb * emb, axis=-1, keepdims=True))
    return emb / jnp.maximum(norm, NORM_EPS)


def _init_params(key):
    k = jax.random.split(key, 6)
    w_conv = jax.random.normal(k[0], (3, 3, CIN, HID), jnp.float32) * 0.1
    bn_gamma = jnp.ones((HID,), jnp.float32)
    bn_beta = jnp.zeros((HID,), jnp.float32)
    bn_mean = jax.random.normal(k[1], (HID,), jnp.float32) * 0.05
    bn_var = jnp.abs(jax.random.normal(k[2], (HID,), jnp.float32)) + 0.5
    w_emb = jax.random.normal(k[3], (HID, EMB), jnp.float32) * 0.1
    b_emb = jax.random.normal(k[4], (EMB,), jnp.float32) * 0.01
    return w_conv, bn_gamma, bn_beta, bn_mean, bn_var, w_emb, b_emb


if __name__ == "__main__":
    key = jax.random.PRNGKey(0)
    kx, kp = jax.random.split(key)
    x = jax.random.normal(kx, (B, CIN, H, W), jnp.float32)  # PyTorch-style NCHW
    params = _init_params(kp)

    out = jax.block_until_ready(network_forward(x, *params))

    # sanity: shape, unit L2 norm, and agreement with a pure-JAX f32 reference
    assert out.shape == (B, EMB)
    norms = jnp.linalg.norm(out, axis=-1)
    assert bool(jnp.all(jnp.abs(norms - 1.0) < 1e-4))

    ref = _reference_forward(x, *params)
    # bf16 MXU inputs (f32 accumulation) -> ~1e-3-level differences vs f32 ref
    assert bool(jnp.allclose(out, ref, atol=1e-2, rtol=1e-2))

    print("KERNEL_OK")
</pallas_src>

<mosaic_0001>
module attributes {stable_mosaic.version = 11 : i64} {
  func.func @_embed_kernel(%arg0: memref<512x28xbf16, #tpu.memory_space<vmem>>, %arg1: memref<28x32xbf16, #tpu.memory_space<vmem>>, %arg2: memref<32x64xf32, #tpu.memory_space<vmem>>, %arg3: memref<1x64xf32, #tpu.memory_space<vmem>>, %arg4: memref<2x64xf32, #tpu.memory_space<vmem>>) attributes {dimension_semantics = [], scalar_prefetch = 0 : i64, scratch_operands = 0 : i64, tpu.core_type = #tpu.core_type<tc>} {
    %c0 = arith.constant 0 : index
    %c0_0 = arith.constant 0 : index
    %0 = vector.load %arg0[%c0, %c0_0] : memref<512x28xbf16, #tpu.memory_space<vmem>>, vector<512x28xbf16>
    %c0_1 = arith.constant 0 : index
    %c0_2 = arith.constant 0 : index
    %1 = vector.load %arg1[%c0_1, %c0_2] : memref<28x32xbf16, #tpu.memory_space<vmem>>, vector<28x32xbf16>
    %cst = arith.constant dense<0.000000e+00> : vector<512x32xf32>
    %2 = tpu.matmul %0, %1, %cst {dimension_numbers = #tpu.dot_dimension_numbers<[1], [0], [0], [1], [0, 0, 1, 1], [], []>} : vector<512x28xbf16>, vector<28x32xbf16>, vector<512x32xf32> -> vector<512x32xf32>
    %cst_3 = arith.constant 0.000000e+00 : f32
    %3 = vector.broadcast %cst_3 : f32 to vector<512x32xf32>
    %4 = arith.maximumf %2, %3 : vector<512x32xf32>
    %5 = vector.shape_cast %4 : vector<512x32xf32> to vector<2x256x32xf32>
    %cst_4 = arith.constant dense<0.000000e+00> : vector<2x32xf32>
    %6 = vector.multi_reduction <add>, %5, %cst_4 [1] : vector<2x256x32xf32> to vector<2x32xf32>
    %c0_5 = arith.constant 0 : index
    %c0_6 = arith.constant 0 : index
    %7 = vector.load %arg2[%c0_5, %c0_6] : memref<32x64xf32, #tpu.memory_space<vmem>>, vector<32x64xf32>
    %cst_7 = arith.constant dense<0.000000e+00> : vector<2x64xf32>
    %8 = tpu.matmul %6, %7, %cst_7 {dimension_numbers = #tpu.dot_dimension_numbers<[1], [0], [0], [1], [0, 0, 1, 1], [], []>} : vector<2x32xf32>, vector<32x64xf32>, vector<2x64xf32> -> vector<2x64xf32>
    %c0_8 = arith.constant 0 : index
    %c0_9 = arith.constant 0 : index
    %9 = vector.load %arg3[%c0_8, %c0_9] : memref<1x64xf32, #tpu.memory_space<vmem>>, vector<1x64xf32>
    %10 = vector.broadcast %9 : vector<1x64xf32> to vector<2x64xf32>
    %11 = arith.addf %8, %10 : vector<2x64xf32>
    %12 = arith.mulf %11, %11 : vector<2x64xf32>
    %cst_10 = arith.constant dense<0.000000e+00> : vector<2xf32>
    %13 = vector.multi_reduction <add>, %12, %cst_10 [1] : vector<2x64xf32> to vector<2xf32>
    %14 = vector.shape_cast %13 : vector<2xf32> to vector<2x1xf32>
    %cst_11 = arith.constant 1.000000e-24 : f32
    %15 = vector.broadcast %cst_11 : f32 to vector<2x1xf32>
    %16 = arith.maximumf %14, %15 : vector<2x1xf32>
    %17 = math.rsqrt %16 : vector<2x1xf32>
    %18 = vector.broadcast %17 : vector<2x1xf32> to vector<2x64xf32>
    %19 = arith.mulf %11, %18 : vector<2x64xf32>
    %c0_12 = arith.constant 0 : index
    %c0_13 = arith.constant 0 : index
    %20 = vector.load %arg4[%c0_12, %c0_13] : memref<2x64xf32, #tpu.memory_space<vmem>>, vector<2x64xf32>
    tpu.vector_store %arg4[%c0_12, %c0_13], %19 {strides = array<i32>} : memref<2x64xf32, #tpu.memory_space<vmem>>, vector<2x64xf32>,
    return
  }
}

</mosaic_0001>

<bundles_post_ra>
// kernel: network_forward.1
= control target key start
LH: loop header
LB: loop body
LE: loop exit
PB: predicated region body
PF: predicated region fallthrough
CT: control target
= control target key end

     0   :  { %vm355_vm0 = vcmask 1045504   ;;  %vm258_vm1 = vcmask 228352   ;;  %s1511_s0 = inlined_call_operand.vmem [shape: bf16[512,28], index: 0, kind: input, shape index: {}]   ;;  %s1512_s1 = inlined_call_operand.vmem [shape: bf16[28,32], index: 1, kind: input, shape index: {}]   ;;  %s1513_s2 = inlined_call_operand.vmem [shape: f32[32,64], index: 2, kind: input, shape index: {}]   ;;  %s1514_s3 = inlined_call_operand.vmem [shape: f32[1,64], index: 3, kind: input, shape index: {}]   ;;  %s1515_s4 = inlined_call_operand.hbm [shape: f32[2,64], index: 4, kind: output, shape index: {}]  }
   0x1   :  { %v1156_v0 = vld [vmem:[%s1512_s1 + $0x8] sm:$0x3f]   ;;  %v1157_v1 = vld [vmem:[%s1512_s1] sm:$0xff]   ;;  %v1160_v5 = vld [vmem:[%s1511_s0 + $0x10] sm:$0xff]  }
   0x2   :  { %1151 = vmatprep.subr.msk.bf16.mxu0 %vm355_vm0, %v1156_v0  ;;  %v357_v2 = vsel %vm355_vm0, %v1156_v0, 0  ;;  %v1158_v3 = vld [vmem:[%s1511_s0] sm:$0xff]   ;;  %1152 = vmatprep.subr.msk.bf16.mxu1 %vm355_vm0, %v1156_v0  ;;  %v1159_v4 = vld [vmem:[%s1511_s0 + $0x8] sm:$0xff]   ;;  %v1161_v6 = vld [vmem:[%s1511_s0 + $0x18] sm:$0xff]  }
   0x3   :  { %1069 = vmatpush3.bf16.msra.mxu0 %v357_v2  ;;  %1149 = vmatpush3.bf16.msra.mxu1 %v357_v2  ;;  %v1162_v7 = vld [vmem:[%s1511_s0 + $0x20] sm:$0xff]   ;;  %v1163_v8 = vld [vmem:[%s1511_s0 + $0x28] sm:$0xff]   ;;  %v1176_v9 = vld [vmem:[%s1511_s0 + $0x90] sm:$0xff]  }
   0x4   :  { %1070 = vmatprep.subr.bf16.mxu0 %v1157_v1  ;;  %1072 = vmatprep.mubr.msk.bf16.mxu0 %vm258_vm1, %v1158_v3  ;;  %v1177_v10 = vld [vmem:[%s1511_s0 + $0x98] sm:$0xff]   ;;  %v1178_v11 = vld [vmem:[%s1511_s0 + $0xa0] sm:$0xff]   ;;  %v1164_v12 = vld [vmem:[%s1511_s0 + $0x30] sm:$0xff]  }
   0x5   :  { %1148 = vmatprep.subr.bf16.mxu1 %v1157_v1  ;;  %1108 = vmatprep.mubr.msk.bf16.mxu1 %vm258_vm1, %v1176_v9  ;;  %v1179_v13 = vld [vmem:[%s1511_s0 + $0xa8] sm:$0xff]   ;;  %v1180_v14 = vld [vmem:[%s1511_s0 + $0xb0] sm:$0xff]   ;;  %v1165_v15 = vld [vmem:[%s1511_s0 + $0x38] sm:$0xff]  }
   0x6   :  { %v1166_v16 = vld [vmem:[%s1511_s0 + $0x40] sm:$0xff]  }
   0x7   :  { %1071 = vmatpush3.bf16.msra.mxu0 %v1157_v1  ;;  %1150 = vmatpush3.bf16.msra.mxu1 %v1157_v1 }
   0xa   :  { %1073 = vmatmul.mubr.msk.bf16.vlgmr.msra.gmra.mxu0 %vm258_vm1, %v1159_v4  ;;  %1109 = vmatmul.mubr.msk.bf16.vlgmr.msra.gmra.mxu1 %vm258_vm1, %v1177_v10 }
   0xb   :  { %1076 = vmatprep.mubr.msk.bf16.mxu0 %vm258_vm1, %v1160_v5  ;;  %1112 = vmatprep.mubr.msk.bf16.mxu1 %vm258_vm1, %v1178_v11 }
  0x12   :  { %1077 = vmatmul.mubr.msk.bf16.gmra.mxu0 %vm258_vm1, %v1161_v6  ;;  %1113 = vmatmul.mubr.msk.bf16.gmra.mxu1 %vm258_vm1, %v1179_v13 }
  0x13   :  { %1080 = vmatprep.mubr.msk.bf16.mxu0 %vm258_vm1, %v1162_v7  ;;  %1116 = vmatprep.mubr.msk.bf16.mxu1 %vm258_vm1, %v1180_v14 }
  0x1a   :  { %1081 = vmatmul.mubr.msk.bf16.gmra.mxu0 %vm258_vm1, %v1163_v8 }
  0x1b   :  { %1084 = vmatprep.mubr.msk.bf16.mxu0 %vm258_vm1, %v1164_v12 }
  0x22   :  { %1085 = vmatmul.mubr.msk.bf16.gmra.mxu0 %vm258_vm1, %v1165_v15 }
  0x23   :  { %9 = vsyncpa [#allocation3], 0  ;;  %1088 = vmatprep.mubr.msk.bf16.mxu0 %vm258_vm1, %v1166_v16  ;;  %v1181_v17 = vld [vmem:[%s1511_s0 + $0xb8] sm:$0xff]   ;;  %v1182_v18 = vld [vmem:[%s1511_s0 + $0xc0] sm:$0xff]   ;;  %v1214_v36 = vmov 0.0   ;;  %vm712_vm2 = vcmask 261120  }
  0x24   :  { %v1167_v19 = vld [vmem:[%s1511_s0 + $0x48] sm:$0xff]   ;;  %v1168_v20 = vld [vmem:[%s1511_s0 + $0x50] sm:$0xff]   ;;  %1117 = vmatmul.mubr.msk.bf16.gmra.mxu1 %vm258_vm1, %v1181_v17  ;;  %v1169_v23 = vld [vmem:[%s1511_s0 + $0x58] sm:$0xff]   ;;  %1136 = vmatprep.subr.mxu1 %v1214_v36  ;;  %vm1215_vm3 = vmmov 0   ;;  %vm864_vm4 = vcmask 1041409   ;;  %vm939_vm5 = vcmask 517120  }
  0x25   :  { %1120 = vmatprep.mubr.msk.bf16.mxu1 %vm258_vm1, %v1182_v18  ;;  %v1183_v21 = vld [vmem:[%s1511_s0 + $0xc8] sm:$0xff]   ;;  %v1184_v22 = vld [vmem:[%s1511_s0 + $0xd0] sm:$0xff]   ;;  %v1170_v24 = vld [vmem:[%s1511_s0 + $0x60] sm:$0xff]   ;;  %s1216_s10 = smov [#allocation2]  }
  0x26   :  { %v1185_v25 = vld [vmem:[%s1511_s0 + $0xd8] sm:$0xff]   ;;  %v1186_v26 = vld [vmem:[%s1511_s0 + $0xe0] sm:$0xff]   ;;  %v1171_v27 = vld [vmem:[%s1511_s0 + $0x68] sm:$0xff]   ;;  %s953_s11 = sshll.u32 %s1216_s10, 4  ;;  %s954_s11 = int_to_ptr.vmem [resolvable:$true] %s953_s11 }
  0x27   :  { %v1172_v28 = vld [vmem:[%s1511_s0 + $0x70] sm:$0xff]   ;;  %v1187_v29 = vld [vmem:[%s1511_s0 + $0xe8] sm:$0xff]   ;;  %v1173_v31 = vld [vmem:[%s1511_s0 + $0x78] sm:$0xff]   ;;  %s1192_s12 = scalar_lea.vmem %s954_s11, 32  ;;  %p1197_p1 = scmp.lt.s32.totalorder %s954_s11, %s954_s11 }
  0x28   :  { %v1188_v30 = vld [vmem:[%s1511_s0 + $0xf0] sm:$0xff]   ;;  %v1174_v32 = vld [vmem:[%s1511_s0 + $0x80] sm:$0xff]   ;;  %v1189_v33 = vld [vmem:[%s1511_s0 + $0xf8] sm:$0xff]   ;;  %p1193_p0 = scmp.ne.s32.totalorder %s954_s11, %s1192_s12  ;;  %p1198_p2 = scmp.lt.s32.totalorder %s1192_s12, %s1192_s12 }
  0x29   :  { %v1175_v34 = vld [vmem:[%s1511_s0 + $0x88] sm:$0xff]   ;;  %v854_v35 = vld [vmem:[%s1513_s2 + $0x18] sm:$0xff]  ;;  %v853_v37 = vld [vmem:[%s1513_s2 + $0x10] sm:$0xff] }
  0x2a   :  { %1089 = vmatmul.mubr.msk.bf16.gmra.mxu0 %vm258_vm1, %v1167_v19  ;;  %1137 = vmatpush3.msra.mxu1 %v854_v35  ;;  %v852_v0 = vld [vmem:[%s1513_s2 + $0x8] sm:$0xff]  ;;  %v851_v1 = vld [vmem:[%s1513_s2] sm:$0xff]  ;;  %p1199_p3 = por %p1198_p2, %p1197_p1 }
  0x2b   :  { %1092 = vmatprep.mubr.msk.bf16.mxu0 %vm258_vm1, %v1168_v20  ;;  %1138 = vmatprep.subr.mxu1 %v1214_v36 }
  0x2c   :  { %1121 = vmatmul.mubr.msk.bf16.gmra.mxu1 %vm258_vm1, %v1183_v21  ;;  %p1200_p4 = pnand %p1199_p3, %p1193_p0 }
  0x2d   :  { %1124 = vmatprep.mubr.msk.bf16.mxu1 %vm258_vm1, %v1184_v22  ;;  %1139 = vmatpush3.msra.mxu1 %v853_v37 }
  0x2e   :  { %1140 = vmatprep.subr.mxu1 %v1214_v36 }
  0x2f   :  { %1141 = vmatpush3.msra.mxu1 %v852_v0 }
  0x30   :  { %1142 = vmatprep.subr.mxu1 %v1214_v36 }
  0x31   :  { %1143 = vmatpush3.msra.mxu1 %v851_v1 }
  0x32   :  { %1093 = vmatmul.mubr.msk.bf16.gmra.mxu0 %vm258_vm1, %v1169_v23 }
  0x33   :  { %1096 = vmatprep.mubr.msk.bf16.mxu0 %vm258_vm1, %v1170_v24 }
  0x34   :  { %1125 = vmatmul.mubr.msk.bf16.gmra.mxu1 %vm258_vm1, %v1185_v25 }
  0x35   :  { %1128 = vmatprep.mubr.msk.bf16.mxu1 %vm258_vm1, %v1186_v26 }
  0x3a   :  { %1097 = vmatmul.mubr.msk.bf16.gmra.mxu0 %vm258_vm1, %v1171_v27 }
  0x3b   :  { %1100 = vmatprep.mubr.msk.bf16.mxu0 %vm258_vm1, %v1172_v28 }
  0x3c   :  { %1129 = vmatmul.mubr.msk.bf16.gmra.mxu1 %vm258_vm1, %v1187_v29 }
  0x3d   :  { %1132 = vmatprep.mubr.msk.bf16.mxu1 %vm258_vm1, %v1188_v30 }
  0x42   :  { %1101 = vmatmul.mubr.msk.bf16.gmra.mxu0 %vm258_vm1, %v1173_v31 }
  0x43   :  { %1104 = vmatprep.mubr.msk.bf16.mxu0 %vm258_vm1, %v1174_v32 }
  0x44   :  { %1133 = vmatmul.mubr.msk.bf16.gmra.mxu1 %vm258_vm1, %v1189_v33 }
  0x45   :  { %1144 = vmatprep.mubr.msk.f32.mxu1 %vm1215_vm3, %v1214_v36 }
  0x4a   :  { %1105 = vmatmul.mubr.msk.bf16.gmra.mxu0 %vm258_vm1, %v1175_v34 }
  0xca   :  { %v1074_v38 = vpop.f32.mrf.mxu0  ;;  %v1386_v58 = vpop.f32.mrf.mxu1 }
  0xcb   :  { %v650_v43 = vmax.f32 %v1074_v38, 0.0 }
  0xcc   :  { %v393_v39 = vpop.f32.mrf.mxu0  ;;  %v1396_v6 = vpop.f32.mrf.mxu1 }
  0xcd   :  { %v648_v41 = vmax.f32 %v393_v39, 0.0  ;;  %v716_v51 = vsel %vm712_vm2, %v650_v43, 0.0 }
  0xce   :  { %v1075_v40 = vpop.f32.mrf.mxu0  ;;  %v1400_v14 = vpop.f32.mrf.mxu1 }
  0xcf   :  { %v713_v46 = vsel %vm712_vm2, %v648_v41, 0.0  ;;  %v651_v47 = vmax.f32 %v1075_v40, 0.0 }
  0xd0   :  { %v396_v42 = vpop.f32.mrf.mxu0  ;;  %v1404_v24 = vpop.f32.mrf.mxu1 }
  0xd1   :  { %v649_v44 = vmax.f32 %v396_v42, 0.0  ;;  %v718_v55 = vsel %vm712_vm2, %v651_v47, 0.0 }
  0xd2   :  { %v1078_v45 = vpop.f32.mrf.mxu0  ;;  %v1408_v32 = vpop.f32.mrf.mxu1 }
  0xd3   :  { %v714_v48 = vsel %vm712_vm2, %v649_v44, 0.0  ;;  %v654_v59 = vmax.f32 %v1078_v45, 0.0 }
  0xd4   :  { %v715_v49 = vadd.f32 %v714_v48, %v713_v46  ;;  %v409_v50 = vpop.f32.mrf.mxu0  ;;  %v1412_v42 = vpop.f32.mrf.mxu1 }
  0xd5   :  { %v652_v52 = vmax.f32 %v409_v50, 0.0  ;;  %v724_v7 = vsel %vm712_vm2, %v654_v59, 0.0 }
  0xd6   :  { %v717_v53 = vadd.f32 %v716_v51, %v715_v49  ;;  %v1079_v54 = vpop.f32.mrf.mxu0  ;;  %v1416_v50 = vpop.f32.mrf.mxu1 }
  0xd7   :  { %v720_v60 = vsel %vm712_vm2, %v652_v52, 0.0  ;;  %v655_v2 = vmax.f32 %v1079_v54, 0.0 }
  0xd8   :  { %v719_v56 = vadd.f32 %v718_v55, %v717_v53  ;;  %v412_v57 = vpop.f32.mrf.mxu0 }
  0xd9   :  { %v653_v61 = vmax.f32 %v412_v57, 0.0  ;;  %v726_v11 = vsel %vm712_vm2, %v655_v2, 0.0 }
  0xda   :  { %v721_v62 = vadd.f32 %v720_v60, %v719_v56  ;;  %v1082_v63 = vpop.f32.mrf.mxu0 }
  0xdb   :  { %v722_v3 = vsel %vm712_vm2, %v653_v61, 0.0  ;;  %v658_v15 = vmax.f32 %v1082_v63, 0.0  ;;  %v1420_v61 = vpop.f32.mrf.mxu1 }
  0xdc   :  { %v723_v4 = vadd.f32 %v722_v3, %v721_v62  ;;  %v425_v5 = vpop.f32.mrf.mxu0 }
  0xdd   :  { %v656_v8 = vmax.f32 %v425_v5, 0.0  ;;  %v732_v25 = vsel %vm712_vm2, %v658_v15, 0.0 }
  0xde   :  { %v725_v9 = vadd.f32 %v724_v7, %v723_v4  ;;  %v1083_v10 = vpop.f32.mrf.mxu0 }
  0xdf   :  { %v728_v16 = vsel %vm712_vm2, %v656_v8, 0.0  ;;  %v659_v20 = vmax.f32 %v1083_v10, 0.0 }
  0xe0   :  { %v727_v12 = vadd.f32 %v726_v11, %v725_v9  ;;  %v428_v13 = vpop.f32.mrf.mxu0 }
  0xe1   :  { %v657_v17 = vmax.f32 %v428_v13, 0.0  ;;  %v734_v29 = vsel %vm712_vm2, %v659_v20, 0.0 }
  0xe2   :  { %v729_v18 = vadd.f32 %v728_v16, %v727_v12  ;;  %v1086_v19 = vpop.f32.mrf.mxu0 }
  0xe3   :  { %v730_v21 = vsel %vm712_vm2, %v657_v17, 0.0  ;;  %v662_v33 = vmax.f32 %v1086_v19, 0.0 }
  0xe4   :  { %v731_v22 = vadd.f32 %v730_v21, %v729_v18  ;;  %v441_v23 = vpop.f32.mrf.mxu0  ;;  %v1424_v5 = vpop.f32.mrf.mxu1 }
  0xe5   :  { %v660_v26 = vmax.f32 %v441_v23, 0.0  ;;  %v740_v43 = vsel %vm712_vm2, %v662_v33, 0.0 }
  0xe6   :  { %v733_v27 = vadd.f32 %v732_v25, %v731_v22  ;;  %v1087_v28 = vpop.f32.mrf.mxu0  ;;  %v1428_v17 = vpop.f32.mrf.mxu1 }
  0xe7   :  { %v736_v34 = vsel %vm712_vm2, %v660_v26, 0.0  ;;  %v663_v38 = vmax.f32 %v1087_v28, 0.0 }
  0xe8   :  { %v735_v30 = vadd.f32 %v734_v29, %v733_v27  ;;  %v444_v31 = vpop.f32.mrf.mxu0  ;;  %v1432_v26 = vpop.f32.mrf.mxu1 }
  0xe9   :  { %v661_v35 = vmax.f32 %v444_v31, 0.0  ;;  %v742_v47 = vsel %vm712_vm2, %v663_v38, 0.0 }
  0xea   :  { %v737_v36 = vadd.f32 %v736_v34, %v735_v30  ;;  %v1090_v37 = vpop.f32.mrf.mxu0 }
  0xeb   :  { %v738_v39 = vsel %vm712_vm2, %v661_v35, 0.0  ;;  %v666_v51 = vmax.f32 %v1090_v37, 0.0  ;;  %v1436_v37 = vpop.f32.mrf.mxu1 }
  0xec   :  { %v739_v40 = vadd.f32 %v738_v39, %v737_v36  ;;  %v457_v41 = vpop.f32.mrf.mxu0 }
  0xed   :  { %v664_v44 = vmax.f32 %v457_v41, 0.0  ;;  %v748_v62 = vsel %vm712_vm2, %v666_v51, 0.0 }
  0xee   :  { %v741_v45 = vadd.f32 %v740_v43, %v739_v40  ;;  %v1091_v46 = vpop.f32.mrf.mxu0 }
  0xef   :  { %v744_v52 = vsel %vm712_vm2, %v664_v44, 0.0  ;;  %v667_v56 = vmax.f32 %v1091_v46, 0.0  ;;  %v1440_v46 = vpop.f32.mrf.mxu1 }
  0xf0   :  { %v743_v48 = vadd.f32 %v742_v47, %v741_v45  ;;  %v460_v49 = vpop.f32.mrf.mxu0 }
  0xf1   :  { %v665_v53 = vmax.f32 %v460_v49, 0.0  ;;  %v750_v2 = vsel %vm712_vm2, %v667_v56, 0.0 }
  0xf2   :  { %v745_v54 = vadd.f32 %v744_v52, %v743_v48  ;;  %v1094_v55 = vpop.f32.mrf.mxu0 }
  0xf3   :  { %v746_v57 = vsel %vm712_vm2, %v665_v53, 0.0  ;;  %v670_v7 = vmax.f32 %v1094_v55, 0.0 }
  0xf4   :  { %v747_v59 = vadd.f32 %v746_v57, %v745_v54  ;;  %v473_v60 = vpop.f32.mrf.mxu0  ;;  %v1444_v57 = vpop.f32.mrf.mxu1 }
  0xf5   :  { %v668_v63 = vmax.f32 %v473_v60, 0.0  ;;  %v756_v18 = vsel %vm712_vm2, %v670_v7, 0.0 }
  0xf6   :  { %v749_v0 = vadd.f32 %v748_v62, %v747_v59  ;;  %v1095_v1 = vpop.f32.mrf.mxu0 }
  0xf7   :  { %v752_v8 = vsel %vm712_vm2, %v668_v63, 0.0  ;;  %v671_v12 = vmax.f32 %v1095_v1, 0.0 }
  0xf8   :  { %v751_v3 = vadd.f32 %v750_v2, %v749_v0  ;;  %v476_v4 = vpop.f32.mrf.mxu0 }
  0xf9   :  { %v669_v9 = vmax.f32 %v476_v4, 0.0  ;;  %v758_v22 = vsel %vm712_vm2, %v671_v12, 0.0 }
  0xfa   :  { %v753_v10 = vadd.f32 %v752_v8, %v751_v3  ;;  %v1098_v11 = vpop.f32.mrf.mxu0  ;;  %v1450_v3 = vpop.f32.mrf.mxu1 }
  0xfb   :  { %v754_v13 = vsel %vm712_vm2, %v669_v9, 0.0  ;;  %v674_v27 = vmax.f32 %v1098_v11, 0.0 }
  0xfc   :  { %v755_v15 = vadd.f32 %v754_v13, %v753_v10  ;;  %v489_v16 = vpop.f32.mrf.mxu0  ;;  %v588_v12 = vpop.f32.mrf.mxu1 }
  0xfd   :  { %v672_v19 = vmax.f32 %v489_v16, 0.0  ;;  %v764_v38 = vsel %vm712_vm2, %v674_v27, 0.0  ;;  %v687_v27 = vmax.f32 %v1400_v14, 0.0 }
  0xfe   :  { %v757_v20 = vadd.f32 %v756_v18, %v755_v15  ;;  %v1099_v21 = vpop.f32.mrf.mxu0  ;;  %v684_v15 = vmax.f32 %v1396_v6, 0.0 }
  0xff   :  { %v760_v28 = vsel %vm712_vm2, %v672_v19, 0.0  ;;  %v675_v33 = vmax.f32 %v1099_v21, 0.0  ;;  %v685_v19 = vmax.f32 %v1404_v24, 0.0  ;;  %v1458_v21 = vpop.f32.mrf.mxu1  ;;  %v795_v24 = vsel %vm712_vm2, %v687_v27, 0.0 }
 0x100   :  { %v759_v23 = vadd.f32 %v758_v22, %v757_v20  ;;  %v492_v25 = vpop.f32.mrf.mxu0  ;;  %v686_v22 = vmax.f32 %v1386_v58, 0.0 }
 0x101   :  { %v673_v29 = vmax.f32 %v492_v25, 0.0  ;;  %v766_v43 = vsel %vm712_vm2, %v675_v33, 0.0 }
 0x102   :  { %v761_v30 = vadd.f32 %v760_v28, %v759_v23  ;;  %v1102_v31 = vpop.f32.mrf.mxu0  ;;  %v789_v23 = vsel %vm712_vm2, %v684_v15, 0.0  ;;  %v791_v28 = vsel %vm712_vm2, %v685_v19, 0.0  ;;  %v793_v6 = vsel %vm712_vm2, %v686_v22, 0.0 }
 0x103   :  { %v762_v34 = vsel %vm712_vm2, %v673_v29, 0.0  ;;  %v678_v47 = vmax.f32 %v1102_v31, 0.0  ;;  %v688_v31 = vmax.f32 %v1412_v42, 0.0 }
 0x104   :  { %v763_v35 = vadd.f32 %v762_v34, %v761_v30  ;;  %v505_v36 = vpop.f32.mrf.mxu0  ;;  %v601_v30 = vpop.f32.mrf.mxu1  ;;  %v689_v34 = vmax.f32 %v1420_v61, 0.0 }
 0x105   :  { %v676_v39 = vmax.f32 %v505_v36, 0.0  ;;  %v772_v59 = vsel %vm712_vm2, %v678_v47, 0.0  ;;  %v690_v36 = vmax.f32 %v1408_v32, 0.0  ;;  %v693_v47 = vmax.f32 %v1436_v37, 0.0 }
 0x106   :  { %v765_v40 = vadd.f32 %v764_v38, %v763_v35  ;;  %v1103_v41 = vpop.f32.mrf.mxu0  ;;  %v1127_v58 = vpop.f32.mrf.mxu1  ;;  %v797_v38 = vsel %vm712_vm2, %v688_v31, 0.0 }
 0x107   :  { %v768_v48 = vsel %vm712_vm2, %v676_v39, 0.0  ;;  %v679_v53 = vmax.f32 %v1103_v41, 0.0  ;;  %v691_v39 = vmax.f32 %v1416_v50, 0.0  ;;  %v801_v42 = vsel %vm712_vm2, %v690_v36, 0.0 }
 0x108   :  { %v767_v44 = vadd.f32 %v766_v43, %v765_v40  ;;  %v508_v45 = vpop.f32.mrf.mxu0  ;;  %v799_v40 = vsel %vm712_vm2, %v689_v34, 0.0  ;;  %v604_v43 = vpop.f32.mrf.mxu1  ;;  %v703_v19 = vmax.f32 %v1127_v58, 0.0 }
 0x109   :  { %v677_v49 = vmax.f32 %v508_v45, 0.0  ;;  %v774_v63 = vsel %vm712_vm2, %v679_v53, 0.0  ;;  %v803_v61 = vsel %vm712_vm2, %v691_v39, 0.0  ;;  %v807_v53 = vsel %vm712_vm2, %v693_v47, 0.0 }
 0x10a   :  { %v769_v51 = vadd.f32 %v768_v48, %v767_v44  ;;  %v1106_v52 = vpop.f32.mrf.mxu0  ;;  %v692_v44 = vmax.f32 %v1428_v17, 0.0  ;;  %v1130_v32 = vpop.f32.mrf.mxu1 }
 0x10b   :  { %v770_v54 = vsel %vm712_vm2, %v677_v49, 0.0  ;;  %v682_v4 = vmax.f32 %v1106_v52, 0.0  ;;  %v694_v49 = vmax.f32 %v1424_v5, 0.0  ;;  %v695_v52 = vmax.f32 %v1432_v26, 0.0 }
 0x10c   :  { %v771_v55 = vadd.f32 %v770_v54, %v769_v51  ;;  %v521_v56 = vpop.f32.mrf.mxu0  ;;  %v805_v51 = vsel %vm712_vm2, %v692_v44, 0.0  ;;  %v698_v5 = vmax.f32 %v1440_v46, 0.0  ;;  %v699_v26 = vmax.f32 %v1450_v3, 0.0 }
 0x10d   :  { %v680_v0 = vmax.f32 %v521_v56, 0.0  ;;  %v785_v13 = vsel %vm712_vm2, %v682_v4, 0.0  ;;  %v809_v17 = vsel %vm712_vm2, %v694_v49, 0.0  ;;  %v696_v56 = vmax.f32 %v1444_v57, 0.0 }
 0x10e   :  { %v773_v60 = vadd.f32 %v772_v59, %v771_v55  ;;  %v1107_v62 = vpop.f32.mrf.mxu0  ;;  %v617_v55 = vpop.f32.mrf.mxu1  ;;  %v811_v37 = vsel %vm712_vm2, %v695_v52, 0.0  ;;  %v700_v57 = vmax.f32 %v601_v30, 0.0  ;;  %v702_v46 = vmax.f32 %v1458_v21, 0.0 }
 0x10f   :  { %v782_v8 = vsel %vm712_vm2, %v680_v0, 0.0  ;;  %v683_v9 = vmax.f32 %v1107_v62, 0.0  ;;  %v813_v0 = vsel %vm712_vm2, %v696_v56, 0.0  ;;  %v706_v31 = vmax.f32 %v1130_v32, 0.0 }
 0x110   :  { %v1448_v1 = vadd.f32 %v774_v63, %v773_v60  ;;  %v524_v2 = vpop.f32.mrf.mxu0  ;;  %v697_v60 = vmax.f32 %v588_v12, 0.0  ;;  %v1131_v63 = vpop.f32.mrf.mxu1  ;;  %v701_v12 = vmax.f32 %v604_v43, 0.0 }
 0x111   :  { %v681_v7 = vmax.f32 %v524_v2, 0.0  ;;  %v787_v18 = vsel %vm712_vm2, %v683_v9, 0.0  ;;  %v817_v9 = vsel %vm712_vm2, %v698_v5, 0.0  ;;  %v833_v36 = vsel %vm712_vm2, %v706_v31, 0.0 }
 0x112   :  { %v815_v4 = vsel %vm712_vm2, %v697_v60, 0.0  ;;  %v823_v3 = vsel %vm712_vm2, %v701_v12, 0.0 }
 0x113   :  { %v783_v10 = vsel %vm712_vm2, %v681_v7, 0.0 }
 0x114   :  { %v784_v11 = vadd.f32 %v783_v10, %v782_v8  ;;  %v620_v8 = vpop.f32.mrf.mxu1 }
 0x116   :  { %v786_v16 = vadd.f32 %v785_v13, %v784_v11  ;;  %v819_v11 = vsel %vm712_vm2, %v699_v26, 0.0  ;;  %v1134_v15 = vpop.f32.mrf.mxu1 }
 0x118   :  { %v788_v20 = vadd.f32 %v787_v18, %v786_v16  ;;  %v821_v16 = vsel %vm712_vm2, %v700_v57, 0.0  ;;  %v633_v22 = vpop.f32.mrf.mxu1 }
 0x11a   :  { %v790_v25 = vadd.f32 %v789_v23, %v788_v20  ;;  %v825_v23 = vsel %vm712_vm2, %v702_v46, 0.0 }
 0x11c   :  { %v792_v29 = vadd.f32 %v791_v28, %v790_v25  ;;  %v704_v25 = vmax.f32 %v617_v55, 0.0  ;;  %v827_v28 = vsel %vm712_vm2, %v703_v19, 0.0 }
 0x11e   :  { %v794_v33 = vadd.f32 %v793_v6, %v792_v29  ;;  %v705_v29 = vmax.f32 %v620_v8, 0.0  ;;  %v1135_v6 = vpop.f32.mrf.mxu1  ;;  %v829_v21 = vsel %vm712_vm2, %v704_v25, 0.0 }
 0x120   :  { %v796_v35 = vadd.f32 %v795_v24, %v794_v33  ;;  %v707_v24 = vmax.f32 %v1131_v63, 0.0  ;;  %v831_v34 = vsel %vm712_vm2, %v705_v29, 0.0  ;;  %v636_v58 = vpop.f32.mrf.mxu1 }
 0x122   :  { %v798_v14 = vadd.f32 %v797_v38, %v796_v35  ;;  %v708_v38 = vmax.f32 %v633_v22, 0.0  ;;  %v835_v39 = vsel %vm712_vm2, %v707_v24, 0.0 }
 0x124   :  { %v800_v41 = vadd.f32 %v799_v40, %v798_v14  ;;  %v709_v40 = vmax.f32 %v636_v58, 0.0  ;;  %v837_v44 = vsel %vm712_vm2, %v708_v38, 0.0 }
 0x126   :  { %v802_v45 = vadd.f32 %v801_v42, %v800_v41  ;;  %v776_v41 = vrot.slane %v1448_v1, 4  ;;  %v710_v42 = vmax.f32 %v1134_v15, 0.0  ;;  %v839_v47 = vsel %vm712_vm2, %v709_v40, 0.0 }
 0x128   :  { %v804_v48 = vadd.f32 %v803_v61, %v802_v45  ;;  %v711_v61 = vmax.f32 %v1135_v6, 0.0  ;;  %v841_v49 = vsel %vm712_vm2, %v710_v42, 0.0 }
 0x12a   :  { %v806_v50 = vadd.f32 %v805_v51, %v804_v48  ;;  %v777_v48 = vadd.f32 %v776_v41, %v1448_v1  ;;  %v1027_v1 = vld [vmem:[%s1514_s3] ss:$0 sm:$0xff] }
 0x12c   :  { %v808_v54 = vadd.f32 %v807_v53, %v806_v50  ;;  %v843_v50 = vsel %vm712_vm2, %v711_v61, 0.0  ;;  %v778_v52 = vrot.slane %v777_v48, 2 }
 0x12e   :  { %v810_v59 = vadd.f32 %v809_v17, %v808_v54  ;;  %v779_v55 = vadd.f32 %v778_v52, %v777_v48 }
 0x130   :  { %v812_v62 = vadd.f32 %v811_v37, %v810_v59  ;;  %v780_v59 = vrot.slane %v779_v55, 1 }
 0x132   :  { %v814_v2 = vadd.f32 %v813_v0, %v812_v62  ;;  %v781_v62 = vadd.f32 %v780_v59, %v779_v55 }
 0x134   :  { %v816_v7 = vadd.f32 %v815_v4, %v814_v2 }
 0x136   :  { %v818_v10 = vadd.f32 %v817_v9, %v816_v7 }
 0x138   :  { %v820_v13 = vadd.f32 %v819_v11, %v818_v10 }
 0x13a   :  { %v822_v18 = vadd.f32 %v821_v16, %v820_v13 }
 0x13c   :  { %v824_v20 = vadd.f32 %v823_v3, %v822_v18 }
 0x13e   :  { %v826_v27 = vadd.f32 %v825_v23, %v824_v20 }
 0x140   :  { %v828_v30 = vadd.f32 %v827_v28, %v826_v27 }
 0x142   :  { %v830_v33 = vadd.f32 %v829_v21, %v828_v30 }
 0x144   :  { %v832_v35 = vadd.f32 %v831_v34, %v830_v33 }
 0x146   :  { %v834_v14 = vadd.f32 %v833_v36, %v832_v35 }
 0x148   :  { %v836_v43 = vadd.f32 %v835_v39, %v834_v14 }
 0x14a   :  { %v838_v45 = vadd.f32 %v837_v44, %v836_v43 }
 0x14c   :  { %v840_v32 = vadd.f32 %v839_v47, %v838_v45 }
 0x14e   :  { %v842_v51 = vadd.f32 %v841_v49, %v840_v32 }
 0x150   :  { %v844_v53 = vadd.f32 %v843_v50, %v842_v51 }
 0x152   :  { %v845_v54 = vrot.slane %v844_v53, 4 }
 0x154   :  { %v846_v17 = vadd.f32 %v845_v54, %v844_v53 }
 0x156   :  { %v847_v56 = vrot.slane %v846_v17, 2 }
 0x158   :  { %v848_v37 = vadd.f32 %v847_v56, %v846_v17 }
 0x15a   :  { %v849_v60 = vrot.slane %v848_v37, 1 }
 0x15c   :  { %v850_v63 = vadd.f32 %v849_v60, %v848_v37 }
 0x15e   :  { %v865_v5 = vsel %vm864_vm4, %v850_v63, %v781_v62 }
 0x15f   :  { %1145 = vmatmul.mubr.msk.f32.vlgmr.msra.gmra.mxu1 %vm712_vm2, %v865_v5 }
 0x21f   :  { %v934_v0 = vpop.f32.mrf.mxu1 }
 0x220   :  { %v935_v2 = vadd.f32 %v1027_v1, %v934_v0 }
 0x221   :  { %v1146_v26 = vpop.f32.mrf.mxu1 }
 0x222   :  { %v938_v4 = vmul.f32 %v935_v2, %v935_v2 }
 0x224   :  { %v940_v7 = vsel %vm939_vm5, %v938_v4, 0.0 }
 0x225   :  { %941 = vadd.xlane.f32.xlu0 %v940_v7 }
 0x2ae   :  { %v942_v8 = vpop.xlane.xlu0 %941 }
 0x2af   :  { %v943_v9 = vmax.f32 %v942_v8, 1e-24 }
 0x2b1   :  { %1190 = vrsqrt.f32 %v943_v9 }
 0x2be   :  { %v1191_v57 = vpop.eup %1190 }
 0x2bf   :  { %v945_v10 = vmul.f32 %v1191_v57, %v935_v2 }
 0x2c1   :  { %946 = vst.msk [vmem:[#allocation2] sm:$0x3] %vm939_vm5, %v945_v10 }
 0x2c2   :  { %1203 = shalt.err (!%p1200_p4)
}
 0x2c3   :  { %956 = dma.vmem_to_hbm [thread:$0]  %s954_s11, 32, %s1515_s4, [#allocation3]  }
 0x2c4   :  { %1212 = dma.done.wait [#allocation3], 32  }
 0x2c5   :  { %1213 = vsyncadd [#allocation3], 4294967264 }
 0x2c6   :  { %960 = vsyncpa [#allocation3], 1 }

</bundles_post_ra>
